<compile_context>
chip_gen: v6e
topology: v6e:2x2x1
jax: 0.10.0
libtpu: 0.0.40
codegen_flags: <defaults>
</compile_context>

<pallas_src>
import functools

import jax
import jax.numpy as jnp
from jax.experimental import pallas as pl
from jax.experimental.pallas import tpu as pltpu

_MIB = 1024 * 1024


# ---------------------------------------------------------------------------
# Hardware-aware sizing helpers
# ---------------------------------------------------------------------------
def _vmem_limit_bytes():
    """Scoped-VMEM limit to request, derived from the chip's physical VMEM."""
    cap = None
    try:
        cap = getattr(pltpu.get_tpu_info(), "vmem_capacity_bytes", None)
    except Exception:
        cap = None
    if not cap:
        cap = 64 * _MIB  # conservative default: v7x per-TensorCore VMEM
    # 3/4 of physical, capped at 64 MiB: ~48 MiB on v7x, 64 MiB on v5e/v6e.
    return int(min((cap * 3) // 4, 64 * _MIB))


def _num_tensorcores():
    """1 on single-TC chips (v5e / v6e); 2 otherwise (v7x / megacore)."""
    try:
        kind = jax.devices()[0].device_kind.lower()
    except Exception:
        return 1
    if "v5" in kind or "v6" in kind:
        return 1
    return 2


def _pick_batch_block(n, per_elem_bytes, block_budget_bytes, num_tc):
    """Batch elements per grid step for the single-pass (batched) path."""
    b = max(1, block_budget_bytes // max(1, per_elem_bytes))
    b = min(b, n)
    if num_tc >= 2 and n >= 2:
        # Keep >= 2 'parallel' grid steps so both TensorCores get work (v7x).
        b = min(b, max(1, n // 2))
    while n % b:
        b -= 1
    return b


# ---------------------------------------------------------------------------
# Kernels
# ---------------------------------------------------------------------------
def _cab_batched_kernel(x_ref, w1t_ref, b1_ref, w2t_ref, b2_ref, o_ref):
    # x_ref : (B_blk, C, HW)   w1t: (C, Hd) already scaled by 1/HW
    # b1    : (1, Hd)          w2t: (Hd, C) already scaled by 2
    # b2    : (1, C)  already scaled by 2
    # Pooled sum straight from the ref, accumulated in f32; x is not kept live
    # across the MLP (re-read for the rescale below).
    s = jnp.sum(x_ref[...].astype(jnp.float32), axis=-1)              # (B, C)
    h = jnp.maximum(
        jnp.dot(s, w1t_ref[...], preferred_element_type=jnp.float32)
        + b1_ref[...], 0.0)                                           # (B, Hd)
    y = jax.nn.sigmoid(
        jnp.dot(h, w2t_ref[...], preferred_element_type=jnp.float32)
        + b2_ref[...])                                                # (B, C)
    o_ref[...] = (x_ref[...].astype(jnp.float32) * y[:, :, None]).astype(o_ref.dtype)


def _cab_sum_kernel(x_ref, s_ref, *, hw, t_hw):
    # Phase 1 of the spatially tiled path: masked f32 sum over HW tiles.
    # x_ref: (1, C, T_HW)   s_ref: (1, 1, C) accumulator (f32)
    @pl.when(pl.program_id(1) == 0)
    def _():
        s_ref[...] = jnp.zeros_like(s_ref)

    lane = jax.lax.broadcasted_iota(jnp.int32, (1, 1, t_hw), 2)
    valid = hw - pl.program_id(1) * t_hw
    xm = jnp.where(lane < valid, x_ref[...].astype(jnp.float32), 0.0)
    s_ref[...] += jnp.sum(xm, axis=-1)[:, None, :]


def _cab_scale_kernel(s_ref, x_ref, w1t_ref, b1_ref, w2t_ref, b2_ref, o_ref):
    # Phase 2: recompute the tiny MLP per tile (MXU filler under the memory
    # roofline) and rescale the x tile.  Out-of-bounds lanes of the last tile
    # are dropped by the clipped output writeback.
    s = s_ref[0]                                                      # (1, C)
    h = jnp.maximum(
        jnp.dot(s, w1t_ref[...], preferred_element_type=jnp.float32)
        + b1_ref[...], 0.0)
    y = jax.nn.sigmoid(
        jnp.dot(h, w2t_ref[...], preferred_element_type=jnp.float32)
        + b2_ref[...])                                                # (1, C)
    o_ref[...] = (x_ref[...].astype(jnp.float32) * y[:, :, None]).astype(o_ref.dtype)


# ---------------------------------------------------------------------------
# Wrapper
# ---------------------------------------------------------------------------
def cab_forward(x_nchw, w1, b1, w2, b2, *, max_block_bytes=None):
    """RCAN channel attention: x * sigmoid(2 * mlp(avgpool(x))).

    x_nchw: (N, C, H, W).  w1: (Hd, C), b1: (Hd,), w2: (C, Hd), b2: (C,).
    """
    N, C, H, W = x_nchw.shape
    Hd = w1.shape[0]
    HW = H * W
    dtype = x_nchw.dtype
    itemsize = jnp.dtype(dtype).itemsize

    # Layout change only (no pad / no slice -> no extra HBM passes).
    x_flat = x_nchw.reshape(N, C, HW)

    vmem_limit = _vmem_limit_bytes()
    if max_block_bytes is not None:
        block_budget = int(max_block_bytes)
    else:
        # 2 arrays (in + out) x 2 double-buffers x block + headroom for the
        # resident weights / internal scratch must fit under vmem_limit.
        block_budget = max(128 * 1024, (vmem_limit - 4 * _MIB) // 4)

    # Fold 1/HW (average pool) and the factor 2 (avgout1 + avgout2 == 2*mlp)
    # into the pre-transposed 1x1-conv weights -> two plain MXU matmuls.
    inv_hw = 1.0 / float(HW)
    w1t_s = jnp.asarray(w1, jnp.float32).T * inv_hw      # (C, Hd)
    b1r = jnp.asarray(b1, jnp.float32).reshape(1, Hd)    # (1, Hd)
    w2t2 = jnp.asarray(w2, jnp.float32).T * 2.0          # (Hd, C)
    b2r2 = jnp.asarray(b2, jnp.float32).reshape(1, C) * 2.0

    per_elem = C * HW * itemsize

    if per_elem <= block_budget:
        # ------------------- single-pass batched path -----------------------
        B_blk = _pick_batch_block(N, per_elem, block_budget, _num_tensorcores())
        n_steps = N // B_blk

        out_flat = pl.pallas_call(
            _cab_batched_kernel,
            out_shape=jax.ShapeDtypeStruct((N, C, HW), dtype),
            grid_spec=pltpu.PrefetchScalarGridSpec(
                num_scalar_prefetch=0,
                grid=(n_steps,),
                in_specs=[
                    pl.BlockSpec((B_blk, C, HW), lambda n: (n, 0, 0)),  # x
                    pl.BlockSpec((C, Hd), lambda n: (0, 0)),   # w1^T / HW
                    pl.BlockSpec((1, Hd), lambda n: (0, 0)),   # b1
                    pl.BlockSpec((Hd, C), lambda n: (0, 0)),   # 2 * w2^T
                    pl.BlockSpec((1, C), lambda n: (0, 0)),    # 2 * b2
                ],
                out_specs=pl.BlockSpec((B_blk, C, HW), lambda n: (n, 0, 0)),
            ),
            compiler_params=pltpu.CompilerParams(
                dimension_semantics=("parallel",),
                vmem_limit_bytes=vmem_limit),
        )(x_flat, w1t_s, b1r, w2t2, b2r2)
        return out_flat.reshape(N, C, H, W)

    # --------------------- spatially tiled two-phase path -------------------
    if HW <= 128:
        T_HW = HW
    else:
        t = max(1, block_budget // (C * itemsize))
        T_HW = max(128, (t // 128) * 128)
        T_HW = min(T_HW, ((HW + 127) // 128) * 128)
    n_hw = pl.cdiv(HW, T_HW)

    # Phase 1: per-(N, C) f32 sums over the spatial axis (masked tail tile).
    sums = pl.pallas_call(
        functools.partial(_cab_sum_kernel, hw=HW, t_hw=T_HW),
        out_shape=jax.ShapeDtypeStruct((N, 1, C), jnp.float32),
        grid_spec=pltpu.PrefetchScalarGridSpec(
            num_scalar_prefetch=0,
            grid=(N, n_hw),
            in_specs=[pl.BlockSpec((1, C, T_HW), lambda n, t: (n, 0, t))],
            out_specs=pl.BlockSpec((1, 1, C), lambda n, t: (n, 0, 0)),
        ),
        compiler_params=pltpu.CompilerParams(
            dimension_semantics=("parallel", "arbitrary"),
            vmem_limit_bytes=vmem_limit),
    )(x_flat)

    # Phase 2: tiny MLP + channel-wise rescale, tile by tile.
    out_flat = pl.pallas_call(
        _cab_scale_kernel,
        out_shape=jax.ShapeDtypeStruct((N, C, HW), dtype),
        grid_spec=pltpu.PrefetchScalarGridSpec(
            num_scalar_prefetch=0,
            grid=(N, n_hw),
            in_specs=[
                pl.BlockSpec((1, 1, C), lambda n, t: (n, 0, 0)),     # sums
                pl.BlockSpec((1, C, T_HW), lambda n, t: (n, 0, t)),  # x tile
                pl.BlockSpec((C, Hd), lambda n, t: (0, 0)),          # w1^T / HW
                pl.BlockSpec((1, Hd), lambda n, t: (0, 0)),          # b1
                pl.BlockSpec((Hd, C), lambda n, t: (0, 0)),          # 2 * w2^T
                pl.BlockSpec((1, C), lambda n, t: (0, 0)),           # 2 * b2
            ],
            out_specs=pl.BlockSpec((1, C, T_HW), lambda n, t: (n, 0, t)),
        ),
        compiler_params=pltpu.CompilerParams(
            dimension_semantics=("parallel", "parallel"),
            vmem_limit_bytes=vmem_limit),
    )(sums, x_flat, w1t_s, b1r, w2t2, b2r2)
    return out_flat.reshape(N, C, H, W)


def cab_reference(x, w1, b1, w2, b2):
    # Pure-JAX reference mirroring the PyTorch forward.
    hi = jax.lax.Precision.HIGHEST
    v = jnp.mean(x, axis=(2, 3))                                      # (N, C)
    h = jnp.maximum(jnp.dot(v, w1.T, precision=hi) + b1, 0.0)         # (N, Hd)
    a = jnp.dot(h, w2.T, precision=hi) + b2                           # (N, C)
    y = jax.nn.sigmoid(2.0 * a)[:, :, None, None]
    return x * y


if __name__ == "__main__":
    # CAB(num_feat=30, squeeze_factor=15) -> hidden = 30 // 15 = 2
    num_feat = 30
    squeeze_factor = 15
    hidden = num_feat // squeeze_factor

    key = jax.random.PRNGKey(0)
    kx, k1, k2, k3, k4, kx2 = jax.random.split(key, 6)

    N, C, H, W = 2, num_feat, 16, 16
    x = jax.random.normal(kx, (N, C, H, W), dtype=jnp.float32)
    # deterministic "conv2d 1x1" parameters (squeezed to linear weights)
    w1 = jax.random.normal(k1, (hidden, C), dtype=jnp.float32) * 0.1
    b1 = jax.random.normal(k2, (hidden,), dtype=jnp.float32) * 0.1
    w2 = jax.random.normal(k3, (C, hidden), dtype=jnp.float32) * 0.1
    b2 = jax.random.normal(k4, (C,), dtype=jnp.float32) * 0.1

    # 1) single-pass batched path
    out = jax.block_until_ready(cab_forward(x, w1, b1, w2, b2))
    ref = cab_reference(x, w1, b1, w2, b2)
    assert out.shape == (N, C, H, W)
    assert jnp.allclose(out, ref, atol=2e-5, rtol=2e-5), "batched path mismatch"

    # 2) spatially tiled two-phase path (forced by a tiny per-block budget),
    #    with an H*W that does not divide the 128-lane tile.
    x2 = jax.random.normal(kx2, (1, num_feat, 20, 20), dtype=jnp.float32)
    out2 = jax.block_until_ready(
        cab_forward(x2, w1, b1, w2, b2, max_block_bytes=16 * 1024))
    ref2 = cab_reference(x2, w1, b1, w2, b2)
    assert out2.shape == x2.shape
    assert jnp.allclose(out2, ref2, atol=2e-5, rtol=2e-5), "tiled path mismatch"

    print("KERNEL_OK")
</pallas_src>

<mosaic_0001>
module attributes {stable_mosaic.version = 11 : i64} {
  func.func @_cab_batched_kernel(%arg0: i32, %arg1: memref<1x30x256xf32, #tpu.memory_space<vmem>>, %arg2: memref<30x2xf32, #tpu.memory_space<vmem>>, %arg3: memref<1x2xf32, #tpu.memory_space<vmem>>, %arg4: memref<2x30xf32, #tpu.memory_space<vmem>>, %arg5: memref<1x30xf32, #tpu.memory_space<vmem>>, %arg6: memref<1x30x256xf32, #tpu.memory_space<vmem>>) attributes {dimension_semantics = [#tpu.dimension_semantics<parallel>], iteration_bounds = array<i64: 2>, scalar_prefetch = 0 : i64, scratch_operands = 0 : i64, tpu.core_type = #tpu.core_type<tc>, window_params = [{transform_indices = @transform_0, window_bounds = array<i64: 1, 30, 256>}, {pipeline_mode = #tpu.pipeline_mode<synchronous>, transform_indices = @transform_1, window_bounds = array<i64: 30, 2>}, {pipeline_mode = #tpu.pipeline_mode<synchronous>, transform_indices = @transform_2, window_bounds = array<i64: 1, 2>}, {pipeline_mode = #tpu.pipeline_mode<synchronous>, transform_indices = @transform_3, window_bounds = array<i64: 2, 30>}, {pipeline_mode = #tpu.pipeline_mode<synchronous>, transform_indices = @transform_4, window_bounds = array<i64: 1, 30>}, {transform_indices = @transform_5, window_bounds = array<i64: 1, 30, 256>}]} {
    %c0 = arith.constant 0 : index
    %c0_0 = arith.constant 0 : index
    %c0_1 = arith.constant 0 : index
    %0 = vector.load %arg1[%c0, %c0_0, %c0_1] : memref<1x30x256xf32, #tpu.memory_space<vmem>>, vector<1x30x256xf32>
    %cst = arith.constant dense<0.000000e+00> : vector<1x30xf32>
    %1 = vector.multi_reduction <add>, %0, %cst [2] : vector<1x30x256xf32> to vector<1x30xf32>
    %c0_2 = arith.constant 0 : index
    %c0_3 = arith.constant 0 : index
    %2 = vector.load %arg2[%c0_2, %c0_3] : memref<30x2xf32, #tpu.memory_space<vmem>>, vector<30x2xf32>
    %cst_4 = arith.constant dense<0.000000e+00> : vector<1x2xf32>
    %3 = tpu.matmul %1, %2, %cst_4 {dimension_numbers = #tpu.dot_dimension_numbers<[1], [0], [0], [1], [0, 0, 1, 1], [], []>} : vector<1x30xf32>, vector<30x2xf32>, vector<1x2xf32> -> vector<1x2xf32>
    %c0_5 = arith.constant 0 : index
    %c0_6 = arith.constant 0 : index
    %4 = vector.load %arg3[%c0_5, %c0_6] : memref<1x2xf32, #tpu.memory_space<vmem>>, vector<1x2xf32>
    %5 = arith.addf %3, %4 : vector<1x2xf32>
    %cst_7 = arith.constant 0.000000e+00 : f32
    %6 = vector.broadcast %cst_7 : f32 to vector<1x2xf32>
    %7 = arith.maximumf %5, %6 : vector<1x2xf32>
    %c0_8 = arith.constant 0 : index
    %c0_9 = arith.constant 0 : index
    %8 = vector.load %arg4[%c0_8, %c0_9] : memref<2x30xf32, #tpu.memory_space<vmem>>, vector<2x30xf32>
    %cst_10 = arith.constant dense<0.000000e+00> : vector<1x30xf32>
    %9 = tpu.matmul %7, %8, %cst_10 {dimension_numbers = #tpu.dot_dimension_numbers<[1], [0], [0], [1], [0, 0, 1, 1], [], []>} : vector<1x2xf32>, vector<2x30xf32>, vector<1x30xf32> -> vector<1x30xf32>
    %c0_11 = arith.constant 0 : index
    %c0_12 = arith.constant 0 : index
    %10 = vector.load %arg5[%c0_11, %c0_12] : memref<1x30xf32, #tpu.memory_space<vmem>>, vector<1x30xf32>
    %11 = arith.addf %9, %10 : vector<1x30xf32>
    %12 = arith.negf %11 : vector<1x30xf32>
    %13 = math.exp %12 : vector<1x30xf32>
    %cst_13 = arith.constant 1.000000e+00 : f32
    %14 = vector.broadcast %cst_13 : f32 to vector<1x30xf32>
    %15 = arith.addf %14, %13 : vector<1x30xf32>
    %16 = arith.divf %14, %15 : vector<1x30xf32>
    %c0_14 = arith.constant 0 : index
    %c0_15 = arith.constant 0 : index
    %c0_16 = arith.constant 0 : index
    %17 = vector.load %arg1[%c0_14, %c0_15, %c0_16] : memref<1x30x256xf32, #tpu.memory_space<vmem>>, vector<1x30x256xf32>
    %18 = vector.shape_cast %16 : vector<1x30xf32> to vector<1x30x1xf32>
    %19 = vector.broadcast %18 : vector<1x30x1xf32> to vector<1x30x256xf32>
    %20 = arith.mulf %17, %19 : vector<1x30x256xf32>
    %c0_17 = arith.constant 0 : index
    %c0_18 = arith.constant 0 : index
    %c0_19 = arith.constant 0 : index
    %21 = vector.load %arg6[%c0_17, %c0_18, %c0_19] : memref<1x30x256xf32, #tpu.memory_space<vmem>>, vector<1x30x256xf32>
    tpu.vector_store %arg6[%c0_17, %c0_18, %c0_19], %20 {strides = array<i32>} : memref<1x30x256xf32, #tpu.memory_space<vmem>>, vector<1x30x256xf32>,
    return
  }
  func.func @transform_0(%arg0: i32) -> (i32, i32, i32) {
    %c0_i32 = arith.constant 0 : i32
    %c0_i32_0 = arith.constant 0 : i32
    %c0_i32_1 = arith.constant 0 : i32
    return %arg0, %c0_i32, %c0_i32_0 : i32, i32, i32
  }
  func.func @transform_1(%arg0: i32) -> (i32, i32) {
    %c0_i32 = arith.constant 0 : i32
    %c0_i32_0 = arith.constant 0 : i32
    %c0_i32_1 = arith.constant 0 : i32
    return %c0_i32, %c0_i32_0 : i32, i32
  }
  func.func @transform_2(%arg0: i32) -> (i32, i32) {
    %c0_i32 = arith.constant 0 : i32
    %c0_i32_0 = arith.constant 0 : i32
    %c0_i32_1 = arith.constant 0 : i32
    return %c0_i32, %c0_i32_0 : i32, i32
  }
  func.func @transform_3(%arg0: i32) -> (i32, i32) {
    %c0_i32 = arith.constant 0 : i32
    %c0_i32_0 = arith.constant 0 : i32
    %c0_i32_1 = arith.constant 0 : i32
    return %c0_i32, %c0_i32_0 : i32, i32
  }
  func.func @transform_4(%arg0: i32) -> (i32, i32) {
    %c0_i32 = arith.constant 0 : i32
    %c0_i32_0 = arith.constant 0 : i32
    %c0_i32_1 = arith.constant 0 : i32
    return %c0_i32, %c0_i32_0 : i32, i32
  }
  func.func @transform_5(%arg0: i32) -> (i32, i32, i32) {
    %c0_i32 = arith.constant 0 : i32
    %c0_i32_0 = arith.constant 0 : i32
    %c0_i32_1 = arith.constant 0 : i32
    return %arg0, %c0_i32, %c0_i32_0 : i32, i32, i32
  }
}

</mosaic_0001>

<bundles_post_ra>
// kernel: tpu_custom_call.1
= control target key start
LH: loop header
LB: loop body
LE: loop exit
PB: predicated region body
PF: predicated region fallthrough
CT: control target
= control target key end

     0   :  { %s632_s18 = smov 0   ;;  %s712_s0 = inlined_call_operand.vmem [shape: f32[2,30,256], index: 0, kind: input, shape index: {}]   ;;  %s713_s1 = inlined_call_operand.vmem [shape: f32[30,2], index: 1, kind: input, shape index: {}]   ;;  %s714_s2 = inlined_call_operand.vmem [shape: f32[1,2], index: 2, kind: input, shape index: {}]   ;;  %s715_s3 = inlined_call_operand.vmem [shape: f32[2,30], index: 3, kind: input, shape index: {}]   ;;  %s716_s4 = inlined_call_operand.vmem [shape: f32[1,30], index: 4, kind: input, shape index: {}]   ;;  %s717_s5 = inlined_call_operand.vmem [shape: f32[2,30,256], index: 5, kind: output, shape index: {}]  }
   0x1 LB: > { %s537_s19 = sadd.s32 4294967295, %s598_s18   ;;  %p541_p0 = scmp.ge.s32.totalorder %s598_s18, 1  ;;  %s598_s18 = sphi %s632_s18, %s15_s18  }
   0x2   : > { %p187_p1 = scmp.lt.s32.totalorder %s598_s18, 3 }
   0x4   : > { %p188_p2 = pnand %p541_p0, %p187_p1 }
   0x5   : > { %p215_p3 = scmp.lt.s32.totalorder (!%p188_p2), %s537_s19, 1 }
   0x6   : > { %191 = sbr.rel (%p188_p2) target bundleno = 716 (0x2cc), region = 40 }
   0xb   : > { %s719_s19 = smov (!%p215_p3, %s537_s19), 1  ;;  %vm242_vm0 = vcmask 1045504   ;;  %v600_v14 = vmov 0.0   ;;  %v251_v15 = vld [vmem:[%s713_s1 + $0x18] sm:$0x3f]  ;;  %v250_v16 = vld [vmem:[%s713_s1 + $0x10] sm:$0xff]  ;;  %v257_v19 = vlaneseq }
   0xc   : > { %s553_s20 = sshll.u32 %s719_s19, 6  ;;  %562 = vmatprep.subr.mxu0 %v600_v14  ;;  %573 = vmatprep.subr.mxu1 %v600_v14  ;;  %v249_v17 = vld [vmem:[%s713_s1 + $0x8] sm:$0xff]  ;;  %v248_v18 = vld [vmem:[%s713_s1] sm:$0xff]  ;;  %vm601_vm1 = vmmov 0   ;;  %vm268_vm2 = vcmask 130112   ;;  %vm275_vm3 = vcmask 195712  }
   0xd   : > { %s219_s23 = scalar_lea.vmem %s712_s0, %s553_s20  ;;  %563 = vmatpush3.msk.msra.mxu0 %vm242_vm0, %v251_v15  ;;  %570 = vmatprep.mubr.msk.f32.mxu0 %vm601_vm1, %v600_v14  ;;  %v258_v20 = vand.u32 127, %v257_v19  ;;  %v260_v21 = vshrl.u32 %v257_v19, 7  ;;  %vm282_vm4 = vcmask 261312   ;;  %vm284_vm5 = vcmask 244736   ;;  %v361_v40 = vld [vmem:[%s715_s3] sm:$0x3]  ;;  %s224_s15 = scalar_lea.vmem %s717_s5, %s553_s20 }
   0xe   : > { %v648_v0 = vld [vmem:[%s219_s23] sm:$0xff]  ;;  %v650_v1 = vld [vmem:[%s219_s23 + $0x8] sm:$0xff]  ;;  %v658_v5 = vld [vmem:[%s219_s23 + $0x10] sm:$0xff]  ;;  %564 = vmatprep.subr.mxu0 %v600_v14  ;;  %575 = vmatprep.mubr.msk.f32.mxu1 %vm601_vm1, %v600_v14  ;;  %vm367_vm6 = vcmask 1041408   ;;  %vm363_vm7 = vcmask 15360  }
   0xf   : > { %v652_v2 = vld [vmem:[%s219_s23 + $0x20] sm:$0xff]  ;;  %v233_v3 = vadd.f32 %v650_v1, %v648_v0  ;;  %v656_v4 = vld [vmem:[%s219_s23 + $0x28] sm:$0xff]  ;;  %v660_v6 = vld [vmem:[%s219_s23 + $0x18] sm:$0xff]  ;;  %565 = vmatpush3.msra.mxu0 %v250_v16  ;;  %v263_v22 = vadd.s32 4294967288, %v258_v20  ;;  %v270_v23 = vadd.s32 4294967280, %v258_v20  ;;  %v277_v24 = vadd.s32 4294967272, %v258_v20  ;;  %574 = vmatpush3.msk.msra.mxu1 %vm367_vm6, %v361_v40 }
  0x10   : > { %v239_v7 = vadd.f32 %v656_v4, %v652_v2  ;;  %v664_v8 = vld [vmem:[%s219_s23 + $0x30] sm:$0x3f]  ;;  %v666_v9 = vld [vmem:[%s219_s23 + $0x38] sm:$0x3f]  ;;  %v236_v10 = vadd.f32 %v660_v6, %v658_v5  ;;  %566 = vmatprep.subr.mxu0 %v600_v14  ;;  %v261_v26 = vsub.s32 %v258_v20, %v260_v21  ;;  %v252_v41 = vld [vmem:[%s714_s2] sm:$0x1] }
  0x11   : > { %234 = vadd.xlane.f32.xlu0 %v233_v3  ;;  %v243_v11 = vsel %vm242_vm0, %v664_v8, 0.0  ;;  %v244_v12 = vsel %vm242_vm0, %v666_v9, 0.0  ;;  %567 = vmatpush3.msra.mxu0 %v249_v17  ;;  %v266_v28 = vsub.s32 %v263_v22, %v260_v21  ;;  %v273_v29 = vsub.s32 %v270_v23, %v260_v21  ;;  %v362_v46 = vld [vmem:[%s716_s4] sm:$0x1] }
  0x12   : > { %240 = vadd.xlane.f32.xlu1 %v239_v7  ;;  %v245_v13 = vadd.f32 %v244_v12, %v243_v11  ;;  %568 = vmatprep.subr.mxu0 %v600_v14  ;;  %v280_v30 = vsub.s32 %v277_v24, %v260_v21  ;;  %v449_v53 = vsub.s32 0, %v260_v21 }
  0x13   : > { %569 = vmatpush3.msra.mxu0 %v248_v18 }
  0x15   : > { %237 = vadd.xlane.f32.xlu0 %v236_v10 }
  0x16   : > { %246 = vadd.xlane.f32.xlu1 %v245_v13 }
  0x9a   : > { %v235_v25 = vpop.xlane.xlu0 %234 }
  0x9b   : > { %v241_v27 = vpop.xlane.xlu1 %240  ;;  %v262_v32 = vrot.slane %v235_v25, %v261_v26 }
  0x9c   : > { %v274_v35 = vrot.slane %v241_v27, %v273_v29 }
  0x9e   : > { %v238_v31 = vpop.xlane.xlu0 %237 }
  0x9f   : > { %v267_v33 = vrot.slane %v238_v31, %v266_v28  ;;  %v247_v34 = vpop.xlane.xlu1 %246 }
  0xa0   : > { %v281_v36 = vrot.slane %v247_v34, %v280_v30 }
  0xa1   : > { %v269_v37 = vsel %vm268_vm2, %v267_v33, %v262_v32 }
  0xa2   : > { %v276_v38 = vsel %vm275_vm3, %v274_v35, %v269_v37 }
  0xa3   : > { %v283_v39 = vsel %vm282_vm4, %v281_v36, %v276_v38 }
  0xa4   : > { %571 = vmatmul.mubr.msk.f32.vlgmr.msra.gmra.mxu0 %vm284_vm5, %v283_v39 }
 0x164   : > { %v356_v42 = vpop.f32.mrf.mxu0 }
 0x165   : > { %v357_v43 = vadd.f32 %v356_v42, %v252_v41 }
 0x166   : > { %v572_v44 = vpop.f32.mrf.mxu0 }
 0x167   : > { %v360_v45 = vmax.f32 %v357_v43, 0.0 }
 0x169   : > { %576 = vmatmul.mubr.msk.f32.vlgmr.msra.gmra.mxu1 %vm363_vm7, %v360_v45 }
 0x229   : > { %v437_v47 = vpop.f32.mrf.mxu1 }
 0x22a   : > { %v438_v48 = vadd.f32 %v437_v47, %v362_v46 }
 0x22b   : > { %v577_v49 = vpop.f32.mrf.mxu1 }
 0x22c   : > { %v550_v50 = vmul.f32 -1.442695, %v438_v48 }
 0x22e   : > { %588 = vpow2.f32 %v550_v50 }
 0x23b   : > { %v589_v51 = vpop.eup %588 }
 0x23c   : > { %v444_v52 = vadd.f32 1.0, %v589_v51 }
 0x23e   : > { %590 = vrcp.f32 %v444_v52 }
 0x24b   : > { %v591_v54 = vpop.eup %590 }
 0x24c   : > { %v450_v55 = vrot.slane %v591_v54, %v449_v53 }
 0x24e   : > { %456 = vbcast.lane.b32.xlu1 %v450_v55, 264  ;;  %452 = vbcast.lane.b32.xlu0 %v450_v55, 256 }
 0x252   : > { %460 = vbcast.lane.b32.xlu1 %v450_v55, 272 }
 0x256   : > { %464 = vbcast.lane.b32.xlu1 %v450_v55, 280 }
 0x2c0   : > { %v457_v56 = vpop.permute.xlu1 %456  ;;  %v453_v57 = vpop.permute.xlu0 %452 }
 0x2c1   : > { %v468_v58 = vmul.f32 %v457_v56, %v658_v5  ;;  %v469_v59 = vmul.f32 %v457_v56, %v660_v6  ;;  %v466_v60 = vmul.f32 %v453_v57, %v648_v0  ;;  %v467_v61 = vmul.f32 %v453_v57, %v650_v1 }
 0x2c3   : > { %476 = vst [vmem:[%s224_s15 + $0x10] sm:$0xff] %v468_v58  ;;  %477 = vst [vmem:[%s224_s15 + $0x18] sm:$0xff] %v469_v59 }
 0x2c4   : > { %474 = vst [vmem:[%s224_s15] sm:$0xff] %v466_v60  ;;  %475 = vst [vmem:[%s224_s15 + $0x8] sm:$0xff] %v467_v61  ;;  %v461_v62 = vpop.permute.xlu1 %460 }
 0x2c5   : > { %v470_v63 = vmul.f32 %v461_v62, %v652_v2  ;;  %v471_v3 = vmul.f32 %v461_v62, %v656_v4 }
 0x2c7   : > { %478 = vst [vmem:[%s224_s15 + $0x20] sm:$0xff] %v470_v63  ;;  %479 = vst [vmem:[%s224_s15 + $0x28] sm:$0xff] %v471_v3 }
 0x2c8   : > { %v465_v7 = vpop.permute.xlu1 %464 }
 0x2c9   : > { %v472_v5 = vmul.f32 %v465_v7, %v664_v8  ;;  %v473_v6 = vmul.f32 %v465_v7, %v666_v9 }
 0x2cb   : > { %480 = vst [vmem:[%s224_s15 + $0x30] sm:$0x3f] %v472_v5  ;;  %481 = vst [vmem:[%s224_s15 + $0x38] sm:$0x3f] %v473_v6 }
 0x2cc PF: > { %s15_s18 = sadd.s32 1, %s598_s18  }
 0x2cd   : > { %p12_p4 = scmp.ge.s32.totalorder %s15_s18, 4  }
 0x2cf   :  { %14 = sbr.rel (!%p12_p4) target bundleno = 1 (0x1), region = 70 }

</bundles_post_ra>
